<compile_context>
chip_gen: v6e
topology: v6e:2x2x1
jax: 0.10.0
libtpu: 0.0.40
codegen_flags: <defaults>
</compile_context>

<pallas_src>
import jax
import jax.numpy as jnp
from jax.experimental import pallas as pl
from jax.experimental.pallas import tpu as pltpu


def _make_kernel(compute_dtype):
    def kernel(alpha_ref, scale_ref, shift_ref, x_ref, o_ref):
        # alpha_ref: SMEM (1, 1) f32 scalar
        # scale_ref/shift_ref: VMEM (row_tile, 1) or (1, lane_tile) f32
        # x_ref/o_ref: VMEM (row_tile, lane_tile)
        alpha = alpha_ref[0, 0].astype(compute_dtype)
        x = x_ref[...].astype(compute_dtype)
        t = jnp.tanh(x * alpha)
        y = (scale_ref[...].astype(compute_dtype) * t
             + shift_ref[...].astype(compute_dtype))
        o_ref[...] = y.astype(o_ref.dtype)
    return kernel


def _pick_tile(dim, unit, max_tile):
    """Largest multiple of `unit` that divides `dim` and is <= max_tile.

    Requires dim % unit == 0 (callers handle the full-extent fallback).
    """
    cap = min(dim, max(unit, (max_tile // unit) * unit))
    best = unit
    for t in range(unit, cap + 1, unit):
        if dim % t == 0:
            best = t
    return best


def soft_clamp_pallas(x_nchw, alpha, scale, shift):
    """x_nchw: (N, C, H, W); alpha: (1,); scale/shift: (C,)."""
    N, C, H, W = x_nchw.shape
    dtype = x_nchw.dtype

    # ---- generation-aware budgets -------------------------------------
    try:
        vmem_cap = int(pltpu.get_tpu_info().vmem_capacity_bytes)
    except Exception:
        vmem_cap = 64 * 1024 * 1024          # conservative (v7x-sized) fallback
    if vmem_cap >= 100 * 1024 * 1024:        # v5e / v6e: 128 MiB per TC
        target_block_bytes = 8 * 1024 * 1024
        vmem_limit = 64 * 1024 * 1024
    else:                                    # v7x: 64 MiB per TC
        target_block_bytes = 4 * 1024 * 1024
        vmem_limit = 40 * 1024 * 1024

    # ---- compute dtype: bf16 EUP/VPU only on v6e/v7x for bf16 streams ----
    compute_dtype = jnp.float32
    if dtype == jnp.bfloat16:
        try:
            kind = jax.devices()[0].device_kind.lower()
        except Exception:
            kind = ""
        if "v5" not in kind:                 # v5e has no bf16 VPU/EUP
            compute_dtype = jnp.bfloat16
    eff_bytes = max(jnp.dtype(dtype).itemsize, jnp.dtype(compute_dtype).itemsize)
    io_bytes = jnp.dtype(dtype).itemsize

    # ---- layout selection (keep the output lane-dense) ------------------
    hw = H * W
    chw = C * H * W
    if hw % 128 == 0 or chw % 128 != 0:
        # Layout A: channel-major rows (N*C, H*W); per-row parameter columns.
        rows, lanes = N * C, hw
        x2d = x_nchw.reshape(rows, lanes)
        scale_p = jnp.tile(scale.astype(jnp.float32), N).reshape(rows, 1)
        shift_p = jnp.tile(shift.astype(jnp.float32), N).reshape(rows, 1)
        params_per_row = True
    else:
        # Layout B: per-sample rows (N, C*H*W); per-lane parameter rows.
        rows, lanes = N, chw
        x2d = x_nchw.reshape(rows, lanes)
        scale_p = jnp.repeat(scale.astype(jnp.float32), hw).reshape(1, lanes)
        shift_p = jnp.repeat(shift.astype(jnp.float32), hw).reshape(1, lanes)
        params_per_row = False
    alpha2d = alpha.reshape(1, 1).astype(jnp.float32)

    # ---- tile selection --------------------------------------------------
    if lanes % 128 == 0:
        lane_budget = max(128, target_block_bytes // (8 * eff_bytes))
        lane_tile = _pick_tile(lanes, 128, lane_budget)
    else:
        lane_tile = lanes                       # full extent required for legality
    # Row budget recomputed against the actual lane tile (fixes oversized
    # fallback blocks when lanes % 128 != 0).
    row_budget = max(8, target_block_bytes // (lane_tile * eff_bytes))
    if rows % 8 == 0:
        row_tile = _pick_tile(rows, 8, row_budget)
    else:
        row_tile = rows                         # full extent required for legality

    # Guarantee >= 2 blocks along a parallel axis so both v7x TCs get work.
    if (rows // row_tile) * (lanes // lane_tile) < 2:
        if lanes % 128 == 0 and lanes >= 256:
            lane_tile = _pick_tile(lanes, 128, lanes // 2)
        elif rows % 8 == 0 and rows >= 16:
            row_tile = _pick_tile(rows, 8, rows // 2)

    grid = (rows // row_tile, lanes // lane_tile)

    # Make sure the vmem limit covers the double-buffered x/out blocks even on
    # awkward full-extent fallbacks, without exceeding physical VMEM.
    io_block_bytes = row_tile * lane_tile * io_bytes
    needed = 4 * io_block_bytes + 2 * 1024 * 1024
    vmem_limit = max(vmem_limit, min(needed, int(vmem_cap * 0.9)))

    # ---- parameter BlockSpecs (tiny; lane axis is the innermost grid dim,
    # so these blocks are not re-fetched across j steps) -------------------
    if params_per_row:
        scale_spec = pl.BlockSpec((row_tile, 1), lambda i, j: (i, 0))
        shift_spec = pl.BlockSpec((row_tile, 1), lambda i, j: (i, 0))
    else:
        scale_spec = pl.BlockSpec((1, lane_tile), lambda i, j: (0, j))
        shift_spec = pl.BlockSpec((1, lane_tile), lambda i, j: (0, j))

    out2d = pl.pallas_call(
        _make_kernel(compute_dtype),
        out_shape=jax.ShapeDtypeStruct((rows, lanes), dtype),
        grid_spec=pltpu.PrefetchScalarGridSpec(
            num_scalar_prefetch=0,
            grid=grid,
            in_specs=[
                pl.BlockSpec((1, 1), lambda i, j: (0, 0),
                             memory_space=pltpu.SMEM),                     # alpha
                scale_spec,                                                # scale
                shift_spec,                                                # shift
                pl.BlockSpec((row_tile, lane_tile), lambda i, j: (i, j)),  # x
            ],
            out_specs=pl.BlockSpec((row_tile, lane_tile), lambda i, j: (i, j)),
        ),
        compiler_params=pltpu.CompilerParams(
            dimension_semantics=("parallel", "parallel"),
            vmem_limit_bytes=int(vmem_limit),
        ),
    )(alpha2d, scale_p, shift_p, x2d)

    # (rows, lanes) -> NCHW: free reshape back (both layouts are contiguous views).
    return out2d.reshape(N, C, H, W)


if __name__ == "__main__":
    key = jax.random.PRNGKey(0)
    k_x, k_s, k_b = jax.random.split(key, 3)
    N, C, H, W = 2, 4, 16, 16

    x = jax.random.normal(k_x, (N, C, H, W), dtype=jnp.float32)

    # Parameters consistent with SoftClamp.__init__ (alpha=0.5, scale~1,
    # shift~0), with small deterministic per-channel variation so the
    # channel broadcast is actually exercised.
    alpha = jnp.ones((1,), jnp.float32) * 0.5
    scale = jnp.ones((C,), jnp.float32) + 0.1 * jax.random.normal(k_s, (C,), jnp.float32)
    shift = jnp.zeros((C,), jnp.float32) + 0.1 * jax.random.normal(k_b, (C,), jnp.float32)

    out = soft_clamp_pallas(x, alpha, scale, shift)
    out = jax.block_until_ready(out)

    # Pure-JAX reference (same broadcasting as the PyTorch module).
    ref = (scale[None, :, None, None] * jnp.tanh(x * alpha[None, :, None, None])
           + shift[None, :, None, None])
    assert out.shape == x.shape and out.dtype == x.dtype
    assert jnp.allclose(out, ref, atol=1e-5, rtol=1e-5)

    print("KERNEL_OK")
</pallas_src>

<mosaic_0001>
module attributes {stable_mosaic.version = 11 : i64} {
  func.func @kernel(%arg0: i32, %arg1: i32, %arg2: memref<1x1xf32, #tpu.memory_space<smem>>, %arg3: memref<8x1xf32, #tpu.memory_space<vmem>>, %arg4: memref<8x1xf32, #tpu.memory_space<vmem>>, %arg5: memref<8x128xf32, #tpu.memory_space<vmem>>, %arg6: memref<8x128xf32, #tpu.memory_space<vmem>>) attributes {dimension_semantics = [#tpu.dimension_semantics<parallel>, #tpu.dimension_semantics<parallel>], iteration_bounds = array<i64: 1, 2>, scalar_prefetch = 0 : i64, scratch_operands = 0 : i64, tpu.core_type = #tpu.core_type<tc>, window_params = [{transform_indices = @transform_0, window_bounds = array<i64: 1, 1>}, {transform_indices = @transform_1, window_bounds = array<i64: 8, 1>}, {transform_indices = @transform_2, window_bounds = array<i64: 8, 1>}, {transform_indices = @transform_3, window_bounds = array<i64: 8, 128>}, {transform_indices = @transform_4, window_bounds = array<i64: 8, 128>}]} {
    %c0 = arith.constant 0 : index
    %c0_0 = arith.constant 0 : index
    %0 = memref.load %arg2[%c0, %c0_0] : memref<1x1xf32, #tpu.memory_space<smem>>
    %c0_1 = arith.constant 0 : index
    %c0_2 = arith.constant 0 : index
    %1 = vector.load %arg5[%c0_1, %c0_2] : memref<8x128xf32, #tpu.memory_space<vmem>>, vector<8x128xf32>
    %2 = vector.broadcast %0 : f32 to vector<8x128xf32>
    %3 = arith.mulf %1, %2 : vector<8x128xf32>
    %4 = math.tanh %3 : vector<8x128xf32>
    %c0_3 = arith.constant 0 : index
    %c0_4 = arith.constant 0 : index
    %5 = vector.load %arg3[%c0_3, %c0_4] : memref<8x1xf32, #tpu.memory_space<vmem>>, vector<8x1xf32>
    %6 = vector.broadcast %5 : vector<8x1xf32> to vector<8x128xf32>
    %7 = arith.mulf %6, %4 : vector<8x128xf32>
    %c0_5 = arith.constant 0 : index
    %c0_6 = arith.constant 0 : index
    %8 = vector.load %arg4[%c0_5, %c0_6] : memref<8x1xf32, #tpu.memory_space<vmem>>, vector<8x1xf32>
    %9 = vector.broadcast %8 : vector<8x1xf32> to vector<8x128xf32>
    %10 = arith.addf %7, %9 : vector<8x128xf32>
    %c0_7 = arith.constant 0 : index
    %c0_8 = arith.constant 0 : index
    %11 = vector.load %arg6[%c0_7, %c0_8] : memref<8x128xf32, #tpu.memory_space<vmem>>, vector<8x128xf32>
    tpu.vector_store %arg6[%c0_7, %c0_8], %10 {strides = array<i32>} : memref<8x128xf32, #tpu.memory_space<vmem>>, vector<8x128xf32>,
    return
  }
  func.func @transform_0(%arg0: i32, %arg1: i32) -> (i32, i32) {
    %c0_i32 = arith.constant 0 : i32
    %c0_i32_0 = arith.constant 0 : i32
    %c0_i32_1 = arith.constant 0 : i32
    return %c0_i32, %c0_i32_0 : i32, i32
  }
  func.func @transform_1(%arg0: i32, %arg1: i32) -> (i32, i32) {
    %c0_i32 = arith.constant 0 : i32
    %c0_i32_0 = arith.constant 0 : i32
    return %arg0, %c0_i32 : i32, i32
  }
  func.func @transform_2(%arg0: i32, %arg1: i32) -> (i32, i32) {
    %c0_i32 = arith.constant 0 : i32
    %c0_i32_0 = arith.constant 0 : i32
    return %arg0, %c0_i32 : i32, i32
  }
  func.func @transform_3(%arg0: i32, %arg1: i32) -> (i32, i32) {
    %c0_i32 = arith.constant 0 : i32
    return %arg0, %arg1 : i32, i32
  }
  func.func @transform_4(%arg0: i32, %arg1: i32) -> (i32, i32) {
    %c0_i32 = arith.constant 0 : i32
    return %arg0, %arg1 : i32, i32
  }
}

</mosaic_0001>

<bundles_post_ra>
// kernel: tpu_custom_call.1
= control target key start
LH: loop header
LB: loop body
LE: loop exit
PB: predicated region body
PF: predicated region fallthrough
CT: control target
= control target key end

     0   :  { %s682_s0 = inlined_call_operand.<no memory space> [shape: f32[1,1], index: 0, kind: input, shape index: {}]   ;;  %s683_s1 = inlined_call_operand.vmem [shape: f32[8,1], index: 1, kind: input, shape index: {}]   ;;  %s684_s2 = inlined_call_operand.vmem [shape: f32[8,1], index: 2, kind: input, shape index: {}]   ;;  %s685_s3 = inlined_call_operand.vmem [shape: f32[8,256], index: 3, kind: input, shape index: {}]   ;;  %s686_s4 = inlined_call_operand.hbm [shape: f32[8,256], index: 4, kind: output, shape index: {}]  }
   0x1   :  { %9 = sst [smem:[#allocation2]] %s682_s0 }
   0x2   :  { %10 = vsyncpa [#allocation4], 0 }
   0x3   :  { %12 = vsyncpa [#allocation4 + $0x1], 0  ;;  %s577_s17 = smov 0   ;;  %s579_s18 = smov 0  }
   0x4   :  { %s581_s19 = smov 0   ;;  %s583_s20 = smov 0  }
   0x5   :  { %s585_s21 = smov 0   ;;  %s587_s22 = smov 0  }
   0x6 LB: > { %s397_s0 = sadd.s32 4294967295, %s545_s22   ;;  %s398_s23 = sadd.s32 4294967294, %s545_s22   ;;  %s545_s22 = sphi %s587_s22, %s18_s22   ;;  %s541_s21 = sphi %s585_s21, %s693_s21   ;;  %s537_s20 = sphi %s583_s20, %s692_s20   ;;  %s533_s19 = sphi %s581_s19, %s691_s19   ;;  %s529_s18 = sphi %s579_s18, %s690_s18   ;;  %s525_s17 = sphi %s577_s17, %s689_s17  }
   0x7   : > { %s27_s24 = sadd.s32 1, %s541_s21  ;;  %s140_s25 = sadd.s32 1, %s533_s19 }
   0x8   : > { %p28_p0 = scmp.ge.s32.totalorder %s27_s24, 2  ;;  %p150_p1 = scmp.ne.s32.totalorder %s533_s19, %s529_s18 }
   0x9   : > { %p151_p2 = scmp.eq.s32.totalorder %s397_s0, 1  ;;  %p156_p3 = scmp.ne.s32.totalorder %s529_s18, %s525_s17 }
   0xa   : > { %s695_s24 = smov (%p28_p0, %s27_s24), 0  ;;  %p157_p5 = scmp.eq.s32.totalorder %s398_s23, 1 }
   0xb   : > { %p617_p4 = por %p151_p2, %p150_p1  ;;  %s136_s27 = ssub.s32 %s541_s21, %s695_s24 }
   0xc   : > { %p403_p6 = scmp.ge.s32.totalorder %s545_s22, 1  ;;  %p138_p7 = scmp.eq.s32.totalorder %s136_s27, 0 }
   0xd   : > { %p624_p8 = por %p157_p5, %p156_p3  ;;  %p203_p9 = scmp.lt.s32.totalorder %s545_s22, 3 }
   0xe   : > { %s630_s29 = scalar_select %p138_p7, %s533_s19, %s140_s25  }
   0xf   : > { %p204_p10 = pnand %p403_p6, %p203_p9 }
  0x10   : > { %p250_p11 = scmp.lt.s32.totalorder (!%p204_p10), %s537_s20, 1  ;;  %s256_s9 = sld [smem:[#allocation2]] (!%p204_p10) }
  0x11   : > { %207 = sbr.rel (%p204_p10) target bundleno = 167 (0xa7), region = 36  ;;  %s237_s14 = sand.u32 (!%p204_p10), 1, %s529_s18  }
  0x12   : > { %s404_s15 = sshll.u32 (!%p204_p10), %s237_s14, 3  ;;  %s407_s16 = sshll.u32 (!%p204_p10), %s537_s20, 7 }
  0x13   : > { %s239_s0 = scalar_lea.vmem (!%p204_p10), [#allocation3], %s404_s15  ;;  %s290_s30 = scalar_lea.hbm (!%p204_p10), %s686_s4, %s407_s16 }
  0x14   : > { %s292_s23 = sshll.u32 (!%p204_p10), %s239_s0, 4  ;;  %s277_s5 = scalar_lea.sflag (!%p204_p10), [#allocation4], %s237_s14  ;;  %s293_s23 = int_to_ptr.vmem [resolvable:$true] %s292_s23 }
  0x15   : > { %s469_s6 = scalar_lea.vmem (!%p204_p10), %s293_s23, 128  ;;  %s548_s7 = smov (!%p204_p10), [#allocation3]  }
  0x16   : > { %v261_v0 = vld [vmem:[%s683_s1] sm:$0xff]  ;;  %v547_v1 = vmov 0   ;;  %s251_s8 = scalar_select %p250_p11, %s537_s20, 1  ;;  %v258_v4 = vstv %s256_s9 }
  0x17   : > { %466 = vset.pattern.permute.xlu0 %v547_v1  ;;  %v268_v2 = vld [vmem:[%s684_s2] sm:$0xff]  ;;  %p470_p12 = scmp.ne.s32.totalorder %s293_s23, %s469_s6 }
  0x18   : > { %264 = vperm.xlu0 %466, %v261_v0   ;;  %s405_s10 = sshll.u32 %s251_s8, 3  ;;  %s473_s8 = sshll.u32 %s548_s7, 4  ;;  %s474_s8 = int_to_ptr.vmem [resolvable:$false] %s473_s8 }
  0x19   : > { %s255_s13 = scalar_lea.vmem %s685_s3, %s405_s10  ;;  %p471_p13 = pnand %p470_p12, %p617_p4 }
  0x1a   : > { %v257_v3 = vld [vmem:[%s255_s13] sm:$0xff]  ;;  %s475_s20 = scalar_lea.vmem %s474_s8, 256  ;;  %p476_p1 = scmp.lt.s32.totalorder %s293_s23, %s474_s8 }
  0x1b   : > { %v259_v5 = vmul.f32 %v258_v4, %v257_v3  ;;  %p472_p0 = pneg %p471_p13  ;;  %p477_p2 = scmp.lt.s32.totalorder %s475_s20, %s469_s6 }
  0x1c   : > { %271 = vperm.xlu0 %466, %v268_v2  }
  0x1d   : > { %467 = vtanh.f32 %v259_v5  ;;  %p478_p3 = por %p477_p2, %p476_p1 }
  0x1f   : > { %p479_p5 = pnand %p478_p3, %p472_p0 }
  0x2a   : > { %v468_v6 = vpop.eup %467 }
  0x93   : > { %v265_v7 = vpop.permute.xlu0 %264 }
  0x94   : > { %v267_v8 = vmul.f32 %v468_v6, %v265_v7 }
  0x97   : > { %v272_v9 = vpop.permute.xlu0 %271 }
  0x98   : > { %v274_v10 = vadd.f32 %v272_v9, %v267_v8 }
  0x9a   : > { %275 = vst [vmem:[%s239_s0] sm:$0xff] %v274_v10 }
  0x9b   : > { %482 = shalt.err (!%p479_p5)
}
  0x9c   : > { %s483_s9 = scalar_lea.hbm %s290_s30, 128  ;;  %s487_s12 = scalar_lea.hbm %s686_s4, 256 }
  0x9d   : > { %p484_p6 = scmp.ne.s32.totalorder %s290_s30, %s483_s9  ;;  %p488_p10 = scmp.lt.s32.totalorder %s290_s30, %s686_s4 }
  0x9e   : > { %p489_p11 = scmp.lt.s32.totalorder %s487_s12, %s483_s9 }
  0x9f   : > { %p485_p7 = pnand %p484_p6, %p617_p4 }
  0xa0   : > { %p490_p12 = por %p489_p11, %p488_p10 }
  0xa1   : > { %p486_p9 = pneg %p485_p7 }
  0xa3   : > { %p491_p13 = pnand %p490_p12, %p486_p9 }
  0xa5   : > { %494 = shalt.err (!%p491_p13)
}
  0xa6   : > { %410 = dma.vmem_to_hbm [thread:$0]  (%p617_p4), %s293_s23, 128, %s290_s30, %s277_s5  }
  0xa7 PF: > { %p416_p0 = scmp.ge.s32.totalorder %s545_s22, 2  ;;  %s304_s15 = sand.u32 1, %s525_s17  }
  0xa8   : > { %s305_s16 = scalar_lea.sflag [#allocation4], %s304_s15 }
  0xa9   : > { %p413_p1 = pnand %p416_p0, %p624_p8 }
  0xab   : > { %p414_p2 = pneg %p413_p1 }
  0xad   : > { %520 = dma.done.wait (%p414_p2), %s305_s16, 128  }
  0xae   : > { %522 = vsyncadd (%p414_p2), %s305_s16, 4294967168  ;;  %s18_s22 = sadd.s32 1, %s545_s22   ;;  %s689_s17 = smov %s529_s18 }
  0xaf   : > { %p15_p3 = scmp.ge.s32.totalorder %s18_s22, 4   ;;  %s690_s18 = smov %s533_s19 }
  0xb0   : > { %s691_s19 = smov %s630_s29  ;;  %s692_s20 = smov %s541_s21 }
  0xb1   : > { %s693_s21 = smov %s695_s24  ;;  %17 = sbr.rel (!%p15_p3) target bundleno = 6 (0x6), region = 77 }
  0xb6   :  { %310 = vsyncpa [#allocation4], 1 }
  0xb7   :  { %312 = vsyncpa [#allocation4 + $0x1], 1 }

</bundles_post_ra>
